<compile_context>
chip_gen: v6e
topology: v6e:2x2x1
jax: 0.10.0
libtpu: 0.0.40
codegen_flags: <defaults>
</compile_context>

<pallas_src>
import jax
import jax.numpy as jnp
from jax.experimental import pallas as pl
from jax.experimental.pallas import tpu as pltpu


LANE = 128


def _round_up(x, m):
    return ((x + m - 1) // m) * m


# ---------------------------------------------------------------------------
# Kernel
# ---------------------------------------------------------------------------
def region_clf_kernel(data_ref, invlen_ref, w_ref, b_ref, out_ref, acc_ref):
    """One grid step: a (region tile, token chunk) pair.

    data_ref   : (TR, TT, Hg)  packed token hiddens (any float dtype; upcast to f32)
    invlen_ref : (TR, 1) f32   1 / max(num_tokens, 1) per region
    w_ref      : (Hg, Cp)      fc weight (g-tiled, transposed, lane-padded)
    b_ref      : (1, Cp)       fc bias (lane-padded)
    out_ref    : (TR, Cp)      logits; resident across the token axis
    acc_ref    : (TR, Hg) f32  token-sum accumulator (VMEM scratch)
    """
    kt = pl.program_id(1)

    @pl.when(kt == 0)
    def _():
        acc_ref[...] = jnp.zeros_like(acc_ref)

    # Padding tokens are exactly zero, so no mask is needed: cast + add only.
    # (Cast fuses into the sublane reduction; no f32 temporary should hit VMEM.)
    acc_ref[...] += jnp.sum(data_ref[...].astype(jnp.float32), axis=1)

    @pl.when(kt == pl.num_programs(1) - 1)
    def _():
        # inv_len is a per-row scalar, so scaling the logits == scaling the sum:
        #   ((sum * inv) @ W) + b  ==  inv * (sum @ W) + b
        logits = jnp.dot(acc_ref[...], w_ref[...],
                         preferred_element_type=jnp.float32)      # (TR, Cp) on MXU
        out_ref[...] = (logits * invlen_ref[...] + b_ref[...]).astype(out_ref.dtype)


# ---------------------------------------------------------------------------
# Generation-aware policy helpers
# ---------------------------------------------------------------------------
def _device_policy():
    """(vmem_budget_bytes, default_target_block_bytes, multi_tensorcore)."""
    try:
        cap = int(pltpu.get_tpu_info().vmem_capacity_bytes)
    except Exception:
        cap = 64 << 20                      # conservative (v7x-sized) fallback
    # Leave headroom for compiler internal scratch / spills (never request 100%).
    budget = cap - max(cap // 8, 8 << 20)   # 64 MiB -> 56 MiB, 128 MiB -> 112 MiB
    target = (8 << 20) if cap >= (100 << 20) else (6 << 20)
    try:
        kind = jax.devices()[0].device_kind.lower()
    except Exception:
        kind = ""
    multi_tc = "v7" in kind                 # only v7x has 2 TCs sharing the grid
    return budget, target, multi_tc


def _pick_divisor(n, want, align):
    """Largest d <= want with n % d == 0 and d % align == 0, else None."""
    best = None
    d = align
    limit = min(n, want)
    while d <= limit:
        if n % d == 0:
            best = d
        d += align
    return best


def _choose_tiles(R, Tg, Hg, itemsize, target_block_bytes,
                  region_tile, token_tile, multi_tc):
    """Pick (rt, tt, R_pad, T_pad); prefer tiles that divide R / Tg (no data pad)."""
    sub = 8 if itemsize >= 4 else (16 if itemsize == 2 else 32)

    # --- token chunk (reduction axis) ---
    if token_tile is not None:
        tt = token_tile
    elif 8 * Tg * Hg * itemsize <= target_block_bytes:
        tt = Tg                                  # whole token axis per block
    else:
        want = max(sub, (target_block_bytes // (8 * Hg * itemsize)) // sub * sub)
        tt = _pick_divisor(Tg, want, sub)        # divisor of Tg -> no token padding
        if tt is None:
            tt = min(want, _round_up(Tg, sub))   # fall back to padding Tg
    T_pad = Tg if Tg % tt == 0 else _round_up(Tg, tt)

    # --- region tile (parallel axis) ---
    if region_tile is not None:
        rt = region_tile
    else:
        per_region = max(tt * Hg * itemsize, 1)
        want = max(8, (target_block_bytes // per_region) // 8 * 8)
        if multi_tc and R > 8:
            # Keep >= 2 grid steps on the parallel axis only where there are 2 TCs.
            want = min(want, _round_up((R + 1) // 2, 8))
        if want >= R:
            rt = R                               # single step; block == full dim
        else:
            rt = _pick_divisor(R, want, 8)       # divisor of R -> no region padding
            if rt is None:
                rt = want
    R_pad = R if R % rt == 0 else _round_up(R, rt)
    return rt, tt, R_pad, T_pad


def _estimate_vmem_bytes(rt, tt, Hg, Cp, itemsize, data_buffers):
    """Tile-padded VMEM footprint (no extra inflation; small margin added later)."""
    sub = 8 if itemsize >= 4 else (16 if itemsize == 2 else 32)
    data_blk = rt * _round_up(tt, sub) * _round_up(Hg, LANE) * itemsize
    inv_blk = _round_up(rt, 8) * LANE * 4
    w_blk = _round_up(Hg, 8) * Cp * 4
    b_blk = 8 * Cp * 4
    out_blk = _round_up(rt, 8) * Cp * 4
    acc_blk = _round_up(rt, 8) * _round_up(Hg, LANE) * 4
    return (data_buffers * data_blk
            + 2 * (inv_blk + w_blk + b_blk + out_blk)
            + acc_blk)


# ---------------------------------------------------------------------------
# Wrapper
# ---------------------------------------------------------------------------
def region_clf_forward(data, lengths, weight, bias, *,
                       region_tile=None, token_tile=None,
                       target_block_bytes=None,
                       data_dtype=None, data_buffers=2):
    """Fused masked-mean-over-tokens + linear projection.

    data    : (R, T, H) token hiddens, zero-padded past `lengths` (contract!)
    lengths : (R,) or (R, 1) true token count per region
    weight  : (H, C)  == torch fc.weight.T
    bias    : (C,) or (1, C)
    Returns (R, C) float32 logits.
    """
    R, T, H = data.shape
    C = weight.shape[-1]
    if data_dtype is not None:
        data = data.astype(data_dtype)          # e.g. bf16 in HBM; f32 accumulation
    itemsize = jnp.dtype(data.dtype).itemsize

    vmem_budget, default_target, multi_tc = _device_policy()
    if target_block_bytes is None:
        target_block_bytes = default_target

    # Lane packing for small hidden sizes: (R, T, H) -> (R, T/g, g*H), g*H == 128.
    g = 1
    if H < LANE and LANE % H == 0 and T % (LANE // H) == 0:
        g = LANE // H
    Tg, Hg = T // g, H * g
    data_packed = data.reshape(R, Tg, Hg)       # contiguous reshape: no data movement

    rt, tt, R_pad, T_pad = _choose_tiles(
        R, Tg, Hg, itemsize, target_block_bytes, region_tile, token_tile, multi_tc)
    Cp = _round_up(C, LANE)                     # lane-dense output / full MXU columns

    # Pad the dominant stream only when the tile picker could not avoid it.
    if R_pad > R or T_pad > Tg:
        data_packed = jnp.pad(
            data_packed, ((0, R_pad - R), (0, T_pad - Tg), (0, 0)))

    # Per-region inverse length (replaces the old per-token scale stream).
    lengths_f = jnp.asarray(lengths, jnp.float32).reshape(R)
    inv_len = (1.0 / jnp.maximum(lengths_f, 1.0)).reshape(R, 1)
    if R_pad > R:
        inv_len = jnp.pad(inv_len, ((0, R_pad - R), (0, 0)))

    # Weight tiled g times along its input axis absorbs the lane-packing fold
    # directly into the MXU matmul (kernel never needs to know g).
    w = jnp.asarray(weight, jnp.float32)                      # (H, C)
    w_tiled = jnp.tile(w, (g, 1)) if g > 1 else w             # (Hg, C)
    w_p = jnp.pad(w_tiled, ((0, 0), (0, Cp - C)))             # (Hg, Cp)
    b_p = jnp.pad(jnp.asarray(bias, jnp.float32).reshape(1, C),
                  ((0, 0), (0, Cp - C)))                      # (1, Cp)

    grid = (R_pad // rt, T_pad // tt)

    data_spec_kwargs = {}
    if data_buffers is not None and data_buffers > 2:
        # Optional deeper pipelining if the data DMA is still exposed.
        data_spec_kwargs["pipeline_mode"] = pl.Buffered(data_buffers)
    data_spec = pl.BlockSpec((rt, tt, Hg), lambda i, k: (i, k, 0),
                             **data_spec_kwargs)

    est = _estimate_vmem_bytes(rt, tt, Hg, Cp, itemsize,
                               data_buffers if data_buffers else 2)
    vmem_limit = int(min(max(est * 5 // 4 + (2 << 20), 16 << 20), vmem_budget))

    out = pl.pallas_call(
        region_clf_kernel,
        out_shape=jax.ShapeDtypeStruct((R_pad, Cp), jnp.float32),
        grid_spec=pltpu.PrefetchScalarGridSpec(
            num_scalar_prefetch=0,
            grid=grid,
            in_specs=[
                data_spec,
                pl.BlockSpec((rt, 1), lambda i, k: (i, 0)),
                pl.BlockSpec((Hg, Cp), lambda i, k: (0, 0)),
                pl.BlockSpec((1, Cp), lambda i, k: (0, 0)),
            ],
            out_specs=pl.BlockSpec((rt, Cp), lambda i, k: (i, 0)),
            scratch_shapes=[pltpu.VMEM((rt, Hg), jnp.float32)],
        ),
        compiler_params=pltpu.CompilerParams(
            # Region axis parallel (megacore on v7x); token reduction axis last.
            dimension_semantics=("parallel", "arbitrary"),
            vmem_limit_bytes=vmem_limit,
        ),
    )(data_packed, inv_len, w_p, b_p)

    return out[:R, :C]


# ---------------------------------------------------------------------------
# Pure-JAX reference (matches the torch module on the ragged list)
# ---------------------------------------------------------------------------
def reference_forward(data_list, weight, bias):
    reprs = jnp.concatenate(
        [jnp.mean(h, axis=0).reshape(1, -1) for h in data_list], axis=0
    )
    return reprs @ weight + bias


if __name__ == "__main__":
    key = jax.random.PRNGKey(0)

    hidden_size = 32
    n_classes = 8
    num_region = 16
    max_tokens = 16

    # deterministic ragged region lengths (each region has >= 1 token)
    region_lengths = [16, 12, 7, 16, 3, 9, 14, 1, 5, 16, 11, 2, 8, 13, 6, 10]
    assert len(region_lengths) == num_region

    # deterministic parameter init (nn.Linear(hidden_size, n_classes) shapes)
    kw, kb, kd = jax.random.split(key, 3)
    bound = 1.0 / (hidden_size ** 0.5)
    weight = jax.random.uniform(
        kw, (hidden_size, n_classes), jnp.float32, minval=-bound, maxval=bound
    )  # stored as [in, out] == torch W.T
    bias = jax.random.uniform(
        kb, (1, n_classes), jnp.float32, minval=-bound, maxval=bound
    )

    # build the ragged data_list, then zero-pad into (R, T, H)
    data_keys = jax.random.split(kd, num_region)
    data_list = [
        jax.random.normal(data_keys[i], (region_lengths[i], hidden_size), jnp.float32)
        for i in range(num_region)
    ]
    data_padded = jnp.stack(
        [jnp.pad(h, ((0, max_tokens - h.shape[0]), (0, 0))) for h in data_list],
        axis=0,
    )  # (R, T, H), zero past each region's length (kernel contract)
    lengths = jnp.array(region_lengths, jnp.float32)

    ref = reference_forward(data_list, weight, bias)

    # float32 data path (tight correctness check)
    out = region_clf_forward(data_padded, lengths, weight, bias)
    out = jax.block_until_ready(out)
    assert out.shape == (num_region, n_classes)
    assert jnp.allclose(out, ref, atol=1e-4, rtol=1e-4), (
        f"f32 max abs err {jnp.max(jnp.abs(out - ref))}"
    )

    # bf16-in-HBM data path (halves the dominant HBM stream; f32 accumulation in-kernel)
    out_bf16 = region_clf_forward(
        data_padded, lengths, weight, bias, data_dtype=jnp.bfloat16
    )
    out_bf16 = jax.block_until_ready(out_bf16)
    assert jnp.allclose(out_bf16, ref, atol=5e-2, rtol=5e-2), (
        f"bf16 max abs err {jnp.max(jnp.abs(out_bf16 - ref))}"
    )

    # TODO(synk): verify in a Mosaic bundle dump that the cast fuses into the token
    # reduction (no f32 temporary written to VMEM); if not, switch to an unrolled
    # lax.fori_loop over sublane-sized token sub-chunks.

    print("KERNEL_OK")
</pallas_src>

<mosaic_0001>
module attributes {stable_mosaic.version = 11 : i64} {
  func.func @region_clf_kernel(%arg0: i32, %arg1: i32, %arg2: memref<16x4x128xf32, #tpu.memory_space<vmem>>, %arg3: memref<16x1xf32, #tpu.memory_space<vmem>>, %arg4: memref<128x128xf32, #tpu.memory_space<vmem>>, %arg5: memref<1x128xf32, #tpu.memory_space<vmem>>, %arg6: memref<16x128xf32, #tpu.memory_space<vmem>>, %arg7: memref<16x128xf32, #tpu.memory_space<vmem>>) attributes {dimension_semantics = [#tpu.dimension_semantics<parallel>, #tpu.dimension_semantics<arbitrary>], iteration_bounds = array<i64: 1, 1>, scalar_prefetch = 0 : i64, scratch_operands = 1 : i64, tpu.core_type = #tpu.core_type<tc>, window_params = [{transform_indices = @transform_0, window_bounds = array<i64: 16, 4, 128>}, {transform_indices = @transform_1, window_bounds = array<i64: 16, 1>}, {pipeline_mode = #tpu.pipeline_mode<synchronous>, transform_indices = @transform_2, window_bounds = array<i64: 128, 128>}, {pipeline_mode = #tpu.pipeline_mode<synchronous>, transform_indices = @transform_3, window_bounds = array<i64: 1, 128>}, {transform_indices = @transform_4, window_bounds = array<i64: 16, 128>}]} {
    %c0_i32 = arith.constant 0 : i32
    %0 = arith.cmpi eq, %arg1, %c0_i32 : i32
    %1 = arith.extui %0 : i1 to i32
    %c0_i32_0 = arith.constant 0 : i32
    %2 = arith.cmpi ne, %1, %c0_i32_0 : i32
    scf.if %2 {
      %cst_9 = arith.constant 0.000000e+00 : f32
      %11 = vector.broadcast %cst_9 : f32 to vector<16x128xf32>
      %c0_10 = arith.constant 0 : index
      %c0_11 = arith.constant 0 : index
      %12 = vector.load %arg7[%c0_10, %c0_11] : memref<16x128xf32, #tpu.memory_space<vmem>>, vector<16x128xf32>
      tpu.vector_store %arg7[%c0_10, %c0_11], %11 {strides = array<i32>} : memref<16x128xf32, #tpu.memory_space<vmem>>, vector<16x128xf32>,
    } else {
    }
    %c0 = arith.constant 0 : index
    %c0_1 = arith.constant 0 : index
    %3 = vector.load %arg7[%c0, %c0_1] : memref<16x128xf32, #tpu.memory_space<vmem>>, vector<16x128xf32>
    %c0_2 = arith.constant 0 : index
    %c0_3 = arith.constant 0 : index
    %c0_4 = arith.constant 0 : index
    %4 = vector.load %arg2[%c0_2, %c0_3, %c0_4] : memref<16x4x128xf32, #tpu.memory_space<vmem>>, vector<16x4x128xf32>
    %cst = arith.constant dense<0.000000e+00> : vector<16x128xf32>
    %5 = vector.multi_reduction <add>, %4, %cst [1] : vector<16x4x128xf32> to vector<16x128xf32>
    %6 = arith.addf %3, %5 : vector<16x128xf32>
    %c0_5 = arith.constant 0 : index
    %c0_6 = arith.constant 0 : index
    %7 = vector.load %arg7[%c0_5, %c0_6] : memref<16x128xf32, #tpu.memory_space<vmem>>, vector<16x128xf32>
    tpu.vector_store %arg7[%c0_5, %c0_6], %6 {strides = array<i32>} : memref<16x128xf32, #tpu.memory_space<vmem>>, vector<16x128xf32>,
    %c0_i32_7 = arith.constant 0 : i32
    %8 = arith.cmpi eq, %arg1, %c0_i32_7 : i32
    %9 = arith.extui %8 : i1 to i32
    %c0_i32_8 = arith.constant 0 : i32
    %10 = arith.cmpi ne, %9, %c0_i32_8 : i32
    scf.if %10 {
      %c0_9 = arith.constant 0 : index
      %c0_10 = arith.constant 0 : index
      %11 = vector.load %arg7[%c0_9, %c0_10] : memref<16x128xf32, #tpu.memory_space<vmem>>, vector<16x128xf32>
      %c0_11 = arith.constant 0 : index
      %c0_12 = arith.constant 0 : index
      %12 = vector.load %arg4[%c0_11, %c0_12] : memref<128x128xf32, #tpu.memory_space<vmem>>, vector<128x128xf32>
      %cst_13 = arith.constant dense<0.000000e+00> : vector<16x128xf32>
      %13 = tpu.matmul %11, %12, %cst_13 {dimension_numbers = #tpu.dot_dimension_numbers<[1], [0], [0], [1], [0, 0, 1, 1], [], []>} : vector<16x128xf32>, vector<128x128xf32>, vector<16x128xf32> -> vector<16x128xf32>
      %c0_14 = arith.constant 0 : index
      %c0_15 = arith.constant 0 : index
      %14 = vector.load %arg3[%c0_14, %c0_15] : memref<16x1xf32, #tpu.memory_space<vmem>>, vector<16x1xf32>
      %15 = vector.broadcast %14 : vector<16x1xf32> to vector<16x128xf32>
      %16 = arith.mulf %13, %15 : vector<16x128xf32>
      %c0_16 = arith.constant 0 : index
      %c0_17 = arith.constant 0 : index
      %17 = vector.load %arg5[%c0_16, %c0_17] : memref<1x128xf32, #tpu.memory_space<vmem>>, vector<1x128xf32>
      %18 = vector.broadcast %17 : vector<1x128xf32> to vector<16x128xf32>
      %19 = arith.addf %16, %18 : vector<16x128xf32>
      %c0_18 = arith.constant 0 : index
      %c0_19 = arith.constant 0 : index
      %20 = vector.load %arg6[%c0_18, %c0_19] : memref<16x128xf32, #tpu.memory_space<vmem>>, vector<16x128xf32>
      tpu.vector_store %arg6[%c0_18, %c0_19], %19 {strides = array<i32>} : memref<16x128xf32, #tpu.memory_space<vmem>>, vector<16x128xf32>,
    } else {
    }
    return
  }
  func.func @transform_0(%arg0: i32, %arg1: i32) -> (i32, i32, i32) {
    %c0_i32 = arith.constant 0 : i32
    %c0_i32_0 = arith.constant 0 : i32
    return %arg0, %arg1, %c0_i32 : i32, i32, i32
  }
  func.func @transform_1(%arg0: i32, %arg1: i32) -> (i32, i32) {
    %c0_i32 = arith.constant 0 : i32
    %c0_i32_0 = arith.constant 0 : i32
    return %arg0, %c0_i32 : i32, i32
  }
  func.func @transform_2(%arg0: i32, %arg1: i32) -> (i32, i32) {
    %c0_i32 = arith.constant 0 : i32
    %c0_i32_0 = arith.constant 0 : i32
    %c0_i32_1 = arith.constant 0 : i32
    return %c0_i32, %c0_i32_0 : i32, i32
  }
  func.func @transform_3(%arg0: i32, %arg1: i32) -> (i32, i32) {
    %c0_i32 = arith.constant 0 : i32
    %c0_i32_0 = arith.constant 0 : i32
    %c0_i32_1 = arith.constant 0 : i32
    return %c0_i32, %c0_i32_0 : i32, i32
  }
  func.func @transform_4(%arg0: i32, %arg1: i32) -> (i32, i32) {
    %c0_i32 = arith.constant 0 : i32
    %c0_i32_0 = arith.constant 0 : i32
    return %arg0, %c0_i32 : i32, i32
  }
}

</mosaic_0001>

<bundles_post_ra>
// kernel: tpu_custom_call.1
= control target key start
LH: loop header
LB: loop body
LE: loop exit
PB: predicated region body
PF: predicated region fallthrough
CT: control target
= control target key end

     0   :  { %9 = vsyncpa [#allocation4], 0  ;;  %s581_s0 = inlined_call_operand.hbm [shape: f32[16,4,128], index: 0, kind: input, shape index: {}]   ;;  %s582_s1 = inlined_call_operand.vmem [shape: f32[16,1], index: 1, kind: input, shape index: {}]   ;;  %s583_s2 = inlined_call_operand.hbm [shape: f32[128,128], index: 2, kind: input, shape index: {}]   ;;  %s584_s3 = inlined_call_operand.vmem [shape: f32[1,128], index: 3, kind: input, shape index: {}]   ;;  %s585_s4 = inlined_call_operand.hbm [shape: f32[16,128], index: 4, kind: output, shape index: {}]  }
   0x1   :  { %10 = vsyncpa [#allocation7], 0 }
   0x2   :  { %11 = vsyncpa [#allocation5], 0  ;;  %s494_s15 = smov [#allocation3]  }
   0x3   :  { %s17_s16 = sshll.u32 %s494_s15, 4  ;;  %s18_s16 = int_to_ptr.vmem [resolvable:$true] %s17_s16 }
   0x4   :  { %s436_s17 = scalar_lea.vmem %s18_s16, 1024  ;;  %p441_p1 = scmp.lt.s32.totalorder %s18_s16, %s18_s16 }
   0x5   :  { %p437_p0 = scmp.ne.s32.totalorder %s18_s16, %s436_s17  ;;  %p442_p2 = scmp.lt.s32.totalorder %s436_s17, %s436_s17 }
   0x7   :  { %p443_p3 = por %p442_p2, %p441_p1 }
   0x9   :  { %p444_p4 = pnand %p443_p3, %p437_p0 }
   0xb   :  { %447 = shalt.err (!%p444_p4)
}
   0xc   :  { %s495_s18 = smov 64   ;;  %s496_s19 = smov 4  }
   0xd   :  { %23 = dma.hbm_to_vmem [thread:$0]  %s581_s0, 1024, %s18_s16, [#allocation4], %s495_s18, %s495_s18, %s496_s19  }
   0xe   :  { %s497_s22 = smov [#allocation6]  }
   0xf   :  { %s31_s23 = sshll.u32 %s497_s22, 4  ;;  %s32_s23 = int_to_ptr.vmem [resolvable:$true] %s31_s23 }
  0x10   :  { %s456_s24 = scalar_lea.vmem %s32_s23, 2048  ;;  %p461_p6 = scmp.lt.s32.totalorder %s32_s23, %s32_s23 }
  0x11   :  { %p457_p5 = scmp.ne.s32.totalorder %s32_s23, %s456_s24  ;;  %p462_p7 = scmp.lt.s32.totalorder %s456_s24, %s456_s24 }
  0x13   :  { %p463_p8 = por %p462_p7, %p461_p6 }
  0x15   :  { %p464_p9 = pnand %p463_p8, %p457_p5 }
  0x17   :  { %467 = shalt.err (!%p464_p9)
}
  0x18   :  { %s498_s25 = smov 128   ;;  %s499_s26 = smov 8  }
  0x19   :  { %37 = dma.hbm_to_vmem [thread:$0]  %s583_s2, 2048, %s32_s23, [#allocation7], %s498_s25, %s498_s25, %s499_s26  }
  0x1a   :  { %488 = dma.done.wait [#allocation4], 1024  }
  0x1b   :  { %489 = vsyncadd [#allocation4], 4294966272 }
  0x1c   :  { %490 = dma.done.wait [#allocation7], 2048  }
  0x1d   :  { %491 = vsyncadd [#allocation7], 4294965248  ;;  %v500_v0 = vmov 0   ;;  %v246_v1 = vld [vmem:[#allocation6 + $0x78] sm:$0xff]  ;;  %v245_v2 = vld [vmem:[#allocation6 + $0x70] sm:$0xff]  ;;  %vm70_vm0 = vcmask 1043456  }
  0x1e   :  { %427 = vset.pattern.permute.xlu0 %v500_v0  ;;  %384 = vmatprep.subr.mxu0 %v246_v1  ;;  %v244_v3 = vld [vmem:[#allocation6 + $0x68] sm:$0xff]  ;;  %v243_v4 = vld [vmem:[#allocation6 + $0x60] sm:$0xff]  ;;  %v242_v5 = vld [vmem:[#allocation6 + $0x58] sm:$0xff]  ;;  %vm199_vm1 = vcmask 1041409   ;;  %vm201_vm2 = vcmask 1042434   ;;  %vm203_vm3 = vcmask 1043459  }
  0x1f   :  { %385 = vmatpush3.msra.mxu0 %v246_v1  ;;  %v54_v6 = vld [vmem:[#allocation3] sm:$0xf]  ;;  %v55_v7 = vld [vmem:[#allocation3 + $0x4] sm:$0xf]  ;;  %v56_v8 = vld [vmem:[#allocation3 + $0x8] sm:$0xf] }
  0x20   :  { %386 = vmatprep.subr.mxu0 %v245_v2  ;;  %v57_v9 = vld [vmem:[#allocation3 + $0xc] sm:$0xf]  ;;  %v58_v10 = vld [vmem:[#allocation3 + $0x10] sm:$0xf]  ;;  %v59_v11 = vld [vmem:[#allocation3 + $0x14] sm:$0xf] }
  0x21   :  { %387 = vmatpush3.msra.mxu0 %v245_v2  ;;  %v60_v12 = vld [vmem:[#allocation3 + $0x18] sm:$0xf]  ;;  %v61_v13 = vld [vmem:[#allocation3 + $0x1c] sm:$0xf]  ;;  %v241_v14 = vld [vmem:[#allocation6 + $0x50] sm:$0xff]  ;;  %v71_v15 = vsel %vm70_vm0, %v54_v6, 0.0 }
  0x22   :  { %388 = vmatprep.subr.mxu0 %v244_v3  ;;  %v78_v16 = vsel %vm70_vm0, %v55_v7, 0.0  ;;  %v85_v17 = vsel %vm70_vm0, %v56_v8, 0.0  ;;  %v92_v18 = vsel %vm70_vm0, %v57_v9, 0.0  ;;  %v72_v19 = vrot.slane %v71_v15, 4  ;;  %v240_v23 = vld [vmem:[#allocation6 + $0x48] sm:$0xff]  ;;  %v239_v32 = vld [vmem:[#allocation6 + $0x40] sm:$0xff] }
  0x23   :  { %389 = vmatpush3.msra.mxu0 %v244_v3  ;;  %v79_v20 = vrot.slane %v78_v16, 4  ;;  %v86_v21 = vrot.slane %v85_v17, 4  ;;  %v93_v22 = vrot.slane %v92_v18, 4  ;;  %v99_v24 = vsel %vm70_vm0, %v58_v10, 0.0  ;;  %v238_v41 = vld [vmem:[#allocation6 + $0x38] sm:$0xff]  ;;  %v322_v46 = vld [vmem:[%s582_s1] sm:$0xff] }
  0x24   :  { %390 = vmatprep.subr.mxu0 %v243_v4  ;;  %v106_v25 = vsel %vm70_vm0, %v59_v11, 0.0  ;;  %v113_v26 = vsel %vm70_vm0, %v60_v12, 0.0  ;;  %v120_v27 = vsel %vm70_vm0, %v61_v13, 0.0  ;;  %v73_v28 = vadd.f32 %v72_v19, %v71_v15  ;;  %v237_v51 = vld [vmem:[#allocation6 + $0x30] sm:$0xff]  ;;  %326 = vperm.xlu0 %427, %v322_v46   ;;  %v236_v56 = vld [vmem:[#allocation6 + $0x28] sm:$0xff]  ;;  %s501_s6 = smov [#allocation8]  }
  0x25   :  { %391 = vmatpush3.msra.mxu0 %v243_v4  ;;  %v80_v29 = vadd.f32 %v79_v20, %v78_v16  ;;  %v87_v30 = vadd.f32 %v86_v21, %v85_v17  ;;  %v94_v31 = vadd.f32 %v93_v22, %v92_v18  ;;  %v100_v33 = vrot.slane %v99_v24, 4  ;;  %v323_v61 = vld [vmem:[%s582_s1 + $0x8] sm:$0xff]  ;;  %v62_v2 = vld [vmem:[#allocation3 + $0x20] sm:$0xf]  ;;  %v63_v3 = vld [vmem:[#allocation3 + $0x24] sm:$0xf] }
  0x26   :  { %392 = vmatprep.subr.mxu0 %v242_v5  ;;  %v107_v34 = vrot.slane %v106_v25, 4  ;;  %v114_v35 = vrot.slane %v113_v26, 4  ;;  %v121_v36 = vrot.slane %v120_v27, 4  ;;  %v74_v37 = vrot.slane %v73_v28, 2  ;;  %v64_v4 = vld [vmem:[#allocation3 + $0x28] sm:$0xf] }
  0x27   :  { %393 = vmatpush3.msra.mxu0 %v242_v5  ;;  %v81_v38 = vrot.slane %v80_v29, 2  ;;  %v88_v39 = vrot.slane %v87_v30, 2  ;;  %v95_v40 = vrot.slane %v94_v31, 2  ;;  %v101_v42 = vadd.f32 %v100_v33, %v99_v24  ;;  %v235_v5 = vld [vmem:[#allocation6 + $0x20] sm:$0xff]  ;;  %v65_v10 = vld [vmem:[#allocation3 + $0x2c] sm:$0xf] }
  0x28   :  { %394 = vmatprep.subr.mxu0 %v241_v14  ;;  %v108_v43 = vadd.f32 %v107_v34, %v106_v25  ;;  %v115_v44 = vadd.f32 %v114_v35, %v113_v26  ;;  %v122_v45 = vadd.f32 %v121_v36, %v120_v27  ;;  %vm205_vm4 = vcmask 1044484   ;;  %v66_v15 = vld [vmem:[#allocation3 + $0x30] sm:$0xf]  ;;  %331 = vperm.xlu0 %427, %v323_v61   ;;  %v67_v17 = vld [vmem:[#allocation3 + $0x34] sm:$0xf]  ;;  %v234_v21 = vld [vmem:[#allocation6 + $0x18] sm:$0xff] }
  0x29   :  { %395 = vmatpush3.msra.mxu0 %v241_v14  ;;  %v75_v47 = vadd.f32 %v74_v37, %v73_v28  ;;  %v82_v48 = vadd.f32 %v81_v38, %v80_v29  ;;  %v89_v49 = vadd.f32 %v88_v39, %v87_v30  ;;  %v96_v50 = vadd.f32 %v95_v40, %v94_v31  ;;  %v233_v30 = vld [vmem:[#allocation6 + $0x10] sm:$0xff]  ;;  %v232_v39 = vld [vmem:[#allocation6 + $0x8] sm:$0xff]  ;;  %s352_s7 = sshll.u32 %s501_s6, 4  ;;  %s353_s7 = int_to_ptr.vmem [resolvable:$true] %s352_s7 }
  0x2a   :  { %396 = vmatprep.subr.mxu0 %v240_v23  ;;  %vm207_vm5 = vcmask 1045509   ;;  %v102_v52 = vrot.slane %v101_v42, 2  ;;  %v109_v53 = vrot.slane %v108_v43, 2  ;;  %v116_v54 = vrot.slane %v115_v44, 2  ;;  %s468_s8 = scalar_lea.vmem %s353_s7, 256  ;;  %p473_p11 = scmp.lt.s32.totalorder %s353_s7, %s353_s7 }
  0x2b   :  { %397 = vmatpush3.msra.mxu0 %v240_v23  ;;  %v123_v55 = vrot.slane %v122_v45, 2  ;;  %vm209_vm6 = vcmask 1046534   ;;  %v76_v57 = vrot.slane %v75_v47, 1  ;;  %v83_v58 = vrot.slane %v82_v48, 1  ;;  %p469_p10 = scmp.ne.s32.totalorder %s353_s7, %s468_s8  ;;  %p474_p12 = scmp.lt.s32.totalorder %s468_s8, %s468_s8 }
  0x2c   :  { %398 = vmatprep.subr.mxu0 %v239_v32  ;;  %v90_v59 = vrot.slane %v89_v49, 1  ;;  %v97_v60 = vrot.slane %v96_v50, 1  ;;  %vm211_vm7 = vcmask 1047559   ;;  %v103_v62 = vadd.f32 %v102_v52, %v101_v42 }
  0x2d   :  { %399 = vmatpush3.msra.mxu0 %v239_v32  ;;  %v110_v63 = vadd.f32 %v109_v53, %v108_v43  ;;  %v117_v0 = vadd.f32 %v116_v54, %v115_v44  ;;  %v124_v1 = vadd.f32 %v123_v55, %v122_v45  ;;  %v77_v6 = vadd.f32 %v76_v57, %v75_v47  ;;  %p475_p13 = por %p474_p12, %p473_p11 }
  0x2e   :  { %400 = vmatprep.subr.mxu0 %v238_v41  ;;  %v84_v7 = vadd.f32 %v83_v58, %v82_v48  ;;  %v91_v8 = vadd.f32 %v90_v59, %v89_v49  ;;  %v98_v9 = vadd.f32 %v97_v60, %v96_v50  ;;  %v104_v11 = vrot.slane %v103_v62, 1  ;;  %v231_v49 = vld [vmem:[#allocation6] sm:$0xff] }
  0x2f   :  { %401 = vmatpush3.msra.mxu0 %v238_v41  ;;  %v111_v12 = vrot.slane %v110_v63, 1  ;;  %v118_v13 = vrot.slane %v117_v0, 1  ;;  %v125_v14 = vrot.slane %v124_v1, 1  ;;  %v127_v18 = vsel %vm70_vm0, %v62_v2, 0.0  ;;  %v68_v41 = vld [vmem:[#allocation3 + $0x38] sm:$0xf]  ;;  %p476_p0 = pnand %p475_p13, %p469_p10 }
  0x30   :  { %402 = vmatprep.subr.mxu0 %v237_v51  ;;  %v200_v16 = vsel %vm199_vm1, %v84_v7, %v77_v6  ;;  %v134_v19 = vsel %vm70_vm0, %v63_v3, 0.0  ;;  %v141_v20 = vsel %vm70_vm0, %v64_v4, 0.0  ;;  %v105_v22 = vadd.f32 %v104_v11, %v103_v62 }
  0x31   :  { %403 = vmatpush3.msra.mxu0 %v237_v51  ;;  %v112_v23 = vadd.f32 %v111_v12, %v110_v63  ;;  %v119_v24 = vadd.f32 %v118_v13, %v117_v0  ;;  %v126_v25 = vadd.f32 %v125_v14, %v124_v1  ;;  %v202_v26 = vsel %vm201_vm2, %v91_v8, %v200_v16  ;;  %v69_v51 = vld [vmem:[#allocation3 + $0x3c] sm:$0xf] }
  0x32   :  { %404 = vmatprep.subr.mxu0 %v236_v56  ;;  %v128_v27 = vrot.slane %v127_v18, 4  ;;  %v135_v28 = vrot.slane %v134_v19, 4  ;;  %v142_v29 = vrot.slane %v141_v20, 4  ;;  %v204_v31 = vsel %vm203_vm3, %v98_v9, %v202_v26 }
  0x33   :  { %405 = vmatpush3.msra.mxu0 %v236_v56  ;;  %v148_v32 = vsel %vm70_vm0, %v65_v10, 0.0  ;;  %v155_v33 = vsel %vm70_vm0, %v66_v15, 0.0  ;;  %v162_v34 = vsel %vm70_vm0, %v67_v17, 0.0  ;;  %v206_v35 = vsel %vm205_vm4, %v105_v22, %v204_v31 }
  0x34   :  { %406 = vmatprep.subr.mxu0 %v235_v5  ;;  %v129_v36 = vadd.f32 %v128_v27, %v127_v18  ;;  %v136_v37 = vadd.f32 %v135_v28, %v134_v19  ;;  %v143_v38 = vadd.f32 %v142_v29, %v141_v20  ;;  %v208_v40 = vsel %vm207_vm5, %v112_v23, %v206_v35 }
  0x35   :  { %407 = vmatpush3.msra.mxu0 %v235_v5  ;;  %v149_v42 = vrot.slane %v148_v32, 4  ;;  %v156_v43 = vrot.slane %v155_v33, 4  ;;  %v163_v44 = vrot.slane %v162_v34, 4  ;;  %v210_v45 = vsel %vm209_vm6, %v119_v24, %v208_v40 }
  0x36   :  { %408 = vmatprep.subr.mxu0 %v234_v21  ;;  %v130_v46 = vrot.slane %v129_v36, 2  ;;  %v137_v47 = vrot.slane %v136_v37, 2  ;;  %v144_v48 = vrot.slane %v143_v38, 2  ;;  %v212_v50 = vsel %vm211_vm7, %v126_v25, %v210_v45 }
  0x37   :  { %409 = vmatpush3.msra.mxu0 %v234_v21  ;;  %v150_v52 = vadd.f32 %v149_v42, %v148_v32  ;;  %v157_v53 = vadd.f32 %v156_v43, %v155_v33  ;;  %v164_v54 = vadd.f32 %v163_v44, %v162_v34  ;;  %416 = vmatprep.mubr.f32.mxu0 %v212_v50  ;;  %v169_v58 = vsel %vm70_vm0, %v68_v41, 0.0 }
  0x38   :  { %410 = vmatprep.subr.mxu0 %v233_v30  ;;  %v131_v55 = vadd.f32 %v130_v46, %v129_v36  ;;  %v138_v56 = vadd.f32 %v137_v47, %v136_v37  ;;  %v145_v57 = vadd.f32 %v144_v48, %v143_v38  ;;  %v170_v62 = vrot.slane %v169_v58, 4  ;;  %v365_v36 = vld [vmem:[%s584_s3] ss:$0 sm:$0xff] }
  0x39   :  { %411 = vmatpush3.msra.mxu0 %v233_v30  ;;  %v151_v59 = vrot.slane %v150_v52, 2  ;;  %v158_v60 = vrot.slane %v157_v53, 2  ;;  %v165_v61 = vrot.slane %v164_v54, 2  ;;  %v176_v2 = vsel %vm70_vm0, %v69_v51, 0.0 }
  0x3a   :  { %412 = vmatprep.subr.mxu0 %v232_v39  ;;  %v132_v63 = vrot.slane %v131_v55, 1  ;;  %v139_v0 = vrot.slane %v138_v56, 1  ;;  %v146_v1 = vrot.slane %v145_v57, 1  ;;  %v171_v6 = vadd.f32 %v170_v62, %v169_v58 }
  0x3b   :  { %413 = vmatpush3.msra.mxu0 %v232_v39  ;;  %v152_v3 = vadd.f32 %v151_v59, %v150_v52  ;;  %v159_v4 = vadd.f32 %v158_v60, %v157_v53  ;;  %v166_v5 = vadd.f32 %v165_v61, %v164_v54  ;;  %v177_v10 = vrot.slane %v176_v2, 4 }
  0x3c   :  { %414 = vmatprep.subr.mxu0 %v231_v49  ;;  %v133_v7 = vadd.f32 %v132_v63, %v131_v55  ;;  %v140_v8 = vadd.f32 %v139_v0, %v138_v56  ;;  %v147_v9 = vadd.f32 %v146_v1, %v145_v57  ;;  %v172_v14 = vrot.slane %v171_v6, 2 }
  0x3d   :  { %415 = vmatpush3.msra.mxu0 %v231_v49  ;;  %v153_v11 = vrot.slane %v152_v3, 1  ;;  %v160_v12 = vrot.slane %v159_v4, 1  ;;  %v167_v13 = vrot.slane %v166_v5, 1  ;;  %v178_v15 = vadd.f32 %v177_v10, %v176_v2 }
  0x3e   :  { %v213_v16 = vsel %vm199_vm1, %v140_v8, %v133_v7  ;;  %v173_v20 = vadd.f32 %v172_v14, %v171_v6 }
  0x3f   :  { %v154_v17 = vadd.f32 %v153_v11, %v152_v3  ;;  %v161_v18 = vadd.f32 %v160_v12, %v159_v4  ;;  %v168_v19 = vadd.f32 %v167_v13, %v166_v5  ;;  %v179_v21 = vrot.slane %v178_v15, 2 }
  0x40   :  { %v214_v22 = vsel %vm201_vm2, %v147_v9, %v213_v16  ;;  %v174_v23 = vrot.slane %v173_v20, 1 }
  0x41   :  { %v215_v24 = vsel %vm203_vm3, %v154_v17, %v214_v22  ;;  %v180_v25 = vadd.f32 %v179_v21, %v178_v15 }
  0x42   :  { %v216_v26 = vsel %vm205_vm4, %v161_v18, %v215_v24  ;;  %v175_v27 = vadd.f32 %v174_v23, %v173_v20 }
  0x43   :  { %v217_v28 = vsel %vm207_vm5, %v168_v19, %v216_v26  ;;  %v181_v29 = vrot.slane %v180_v25, 1 }
  0x44   :  { %v218_v30 = vsel %vm209_vm6, %v175_v27, %v217_v28 }
  0x45   :  { %v182_v31 = vadd.f32 %v181_v29, %v180_v25 }
  0x47   :  { %v219_v32 = vsel %vm211_vm7, %v182_v31, %v218_v30 }
  0x48   :  { %417 = vmatmul.mubr.f32.vlgmr.msra.gmra.mxu0 %v219_v32 }
  0x9f   :  { %v327_v33 = vpop.permute.xlu0 %326 }
  0xa3   :  { %v332_v34 = vpop.permute.xlu0 %331 }
 0x108   :  { %v418_v35 = vpop.f32.mrf.mxu0 }
 0x109   :  { %v335_v37 = vmul.f32 %v418_v35, %v332_v34 }
 0x10a   :  { %v313_v38 = vpop.f32.mrf.mxu0 }
 0x10b   :  { %v344_v39 = vadd.f32 %v365_v36, %v335_v37  ;;  %v334_v40 = vmul.f32 %v327_v33, %v313_v38 }
 0x10d   :  { %346 = vst [vmem:[#allocation8 + $0x8] sm:$0xff] %v344_v39  ;;  %v343_v41 = vadd.f32 %v365_v36, %v334_v40 }
 0x10f   :  { %345 = vst [vmem:[#allocation8] sm:$0xff] %v343_v41 }
 0x110   :  { %479 = shalt.err (!%p476_p0)
}
 0x111   :  { %358 = dma.vmem_to_hbm [thread:$0]  %s353_s7, 256, %s585_s4, [#allocation5], %s498_s25, %s498_s25, %s499_s26  }
 0x112   :  { %492 = dma.done.wait [#allocation5], 256  }
 0x113   :  { %493 = vsyncadd [#allocation5], 4294967040 }
 0x114   :  { %362 = vsyncpa [#allocation4], 1 }
 0x115   :  { %363 = vsyncpa [#allocation7], 1 }
 0x116   :  { %364 = vsyncpa [#allocation5], 1 }

</bundles_post_ra>
